<compile_context>
chip_gen: v6e
topology: v6e:2x2x1
jax: 0.10.0
libtpu: 0.0.40
codegen_flags: <defaults>
</compile_context>

<pallas_src>
import functools

import jax
import jax.numpy as jnp
from jax import lax
from jax.experimental import pallas as pl
from jax.experimental.pallas import tpu as pltpu

LANES = 128
MAX_BLOCK_ROWS = 1024  # (1024, 128) f32 = 512 KiB per input block


def _mse_kernel(p_ref, t_ref, o_ref, acc_ref, *, rows, block_rows,
                steps_per_split):
    c = pl.program_id(0)  # TensorCore split ("parallel")
    i = pl.program_id(1)  # sequential reduction step ("arbitrary")

    @pl.when(i == 0)
    def _init():
        acc_ref[...] = jnp.zeros_like(acc_ref)

    d = p_ref[...].astype(jnp.float32) - t_ref[...].astype(jnp.float32)
    sq = d * d

    # Mask rows past the end of the real array: covers the partial tail block
    # and any fully-out-of-range blocks of the second split (whose index_map
    # was clamped to a valid block index).
    row0 = (c * steps_per_split + i) * block_rows
    global_row = row0 + lax.broadcasted_iota(jnp.int32, sq.shape, 0)
    sq = jnp.where(global_row < rows, sq, 0.0)

    # Lane-wide partial sums; defer the cross-lane reduce to the wrapper.
    acc_ref[...] += jnp.sum(sq, axis=0, keepdims=True)

    @pl.when(i == pl.num_programs(1) - 1)
    def _epilogue():
        o_ref[...] = acc_ref[...]


def station_mse(pred, target):
    """Scalar MSE(pred, target): mean over all elements (nn.MSELoss default)."""
    assert pred.shape == target.shape, "pred/target must have the same shape"
    n_elems = pred.size

    # Flatten to a lane-dense (rows, 128) slab. Inputs keep their native dtype
    # (cast happens per-block inside the kernel). Padding is only needed when
    # the element count is not a multiple of 128; padded zeros contribute 0.
    p = jnp.ravel(pred)
    t = jnp.ravel(target)
    rows = pl.cdiv(n_elems, LANES)
    lane_pad = rows * LANES - n_elems
    if lane_pad:
        p = jnp.pad(p, (0, lane_pad))
        t = jnp.pad(t, (0, lane_pad))
    p2 = p.reshape(rows, LANES)
    t2 = t.reshape(rows, LANES)

    # Block size: full extent for small inputs, else 1024 rows (8-divisible).
    block_rows = rows if rows <= MAX_BLOCK_ROWS else MAX_BLOCK_ROWS
    grid_blocks = pl.cdiv(rows, block_rows)

    # Split the stream across 2 TensorCores (v7x); degenerate on v5e/v6e.
    num_splits = 2 if grid_blocks >= 2 else 1
    steps_per_split = pl.cdiv(grid_blocks, num_splits)

    def in_map(c, i):
        # Clamp so padded steps of the last split still point at a valid block
        # (their contribution is zeroed by the in-kernel row mask).
        return (jnp.minimum(c * steps_per_split + i, grid_blocks - 1), 0)

    kernel = functools.partial(
        _mse_kernel, rows=rows, block_rows=block_rows,
        steps_per_split=steps_per_split)

    partial_sums = pl.pallas_call(
        kernel,
        out_shape=jax.ShapeDtypeStruct((num_splits, LANES), jnp.float32),
        grid_spec=pltpu.PrefetchScalarGridSpec(
            num_scalar_prefetch=0,
            grid=(num_splits, steps_per_split),
            in_specs=[
                pl.BlockSpec((block_rows, LANES), in_map),
                pl.BlockSpec((block_rows, LANES), in_map),
            ],
            out_specs=pl.BlockSpec((1, LANES), lambda c, i: (c, 0)),
            scratch_shapes=[pltpu.VMEM((1, LANES), jnp.float32)],
        ),
        compiler_params=pltpu.CompilerParams(
            dimension_semantics=("parallel", "arbitrary"),
        ),
    )(p2, t2)

    return jnp.sum(partial_sums) / n_elems


if __name__ == "__main__":
    key = jax.random.PRNGKey(0)
    k1, k2 = jax.random.split(key)
    # Small NCHW-shaped prediction/target pair.
    pred = jax.random.normal(k1, (2, 4, 16, 16), dtype=jnp.float32)
    target = jax.random.normal(k2, (2, 4, 16, 16), dtype=jnp.float32)

    mse = station_mse(pred, target)
    jax.block_until_ready(mse)
    ref = jnp.mean((pred - target) ** 2)
    assert jnp.allclose(mse, ref, rtol=1e-5, atol=1e-6), (mse, ref)

    # Extra coverage: 2-way split, partial tail block, bf16 inputs, unaligned size.
    extra_cases = [
        ((8, 8, 64, 64), jnp.float32),    # rows=2048 -> 2 splits, full blocks
        ((3, 5, 100, 128), jnp.float32),  # rows=1500 -> partial tail block
        ((2, 4, 16, 16), jnp.bfloat16),   # 16-bit inputs, in-kernel cast
        ((2, 3, 15, 17), jnp.float32),    # n % 128 != 0 -> lane-pad path
    ]
    for seed, (shape, dtype) in enumerate(extra_cases, start=1):
        ka, kb = jax.random.split(jax.random.PRNGKey(seed))
        a = jax.random.normal(ka, shape, dtype=jnp.float32).astype(dtype)
        b = jax.random.normal(kb, shape, dtype=jnp.float32).astype(dtype)
        got = station_mse(a, b)
        jax.block_until_ready(got)
        want = jnp.mean((a.astype(jnp.float32) - b.astype(jnp.float32)) ** 2)
        assert jnp.allclose(got, want, rtol=1e-5, atol=1e-5), (shape, got, want)

    print("KERNEL_OK")
</pallas_src>

<mosaic_0001>
module attributes {stable_mosaic.version = 11 : i64} {
  func.func @_mse_kernel(%arg0: i32, %arg1: i32, %arg2: memref<16x128xf32, #tpu.memory_space<vmem>>, %arg3: memref<16x128xf32, #tpu.memory_space<vmem>>, %arg4: memref<1x128xf32, #tpu.memory_space<vmem>>, %arg5: memref<1x128xf32, #tpu.memory_space<vmem>>) attributes {dimension_semantics = [#tpu.dimension_semantics<parallel>, #tpu.dimension_semantics<arbitrary>], iteration_bounds = array<i64: 1, 1>, scalar_prefetch = 0 : i64, scratch_operands = 1 : i64, tpu.core_type = #tpu.core_type<tc>, window_params = [{transform_indices = @transform_0, window_bounds = array<i64: 16, 128>}, {transform_indices = @transform_1, window_bounds = array<i64: 16, 128>}, {transform_indices = @transform_2, window_bounds = array<i64: 1, 128>}]} {
    %c0_i32 = arith.constant 0 : i32
    %0 = arith.cmpi eq, %arg1, %c0_i32 : i32
    %1 = arith.extui %0 : i1 to i32
    %c0_i32_0 = arith.constant 0 : i32
    %2 = arith.cmpi ne, %1, %c0_i32_0 : i32
    scf.if %2 {
      %cst_12 = arith.constant 0.000000e+00 : f32
      %25 = vector.broadcast %cst_12 : f32 to vector<1x128xf32>
      %c0_13 = arith.constant 0 : index
      %c0_14 = arith.constant 0 : index
      %26 = vector.load %arg5[%c0_13, %c0_14] : memref<1x128xf32, #tpu.memory_space<vmem>>, vector<1x128xf32>
      tpu.vector_store %arg5[%c0_13, %c0_14], %25 {strides = array<i32>} : memref<1x128xf32, #tpu.memory_space<vmem>>, vector<1x128xf32>,
    } else {
    }
    %c0 = arith.constant 0 : index
    %c0_1 = arith.constant 0 : index
    %3 = vector.load %arg2[%c0, %c0_1] : memref<16x128xf32, #tpu.memory_space<vmem>>, vector<16x128xf32>
    %c0_2 = arith.constant 0 : index
    %c0_3 = arith.constant 0 : index
    %4 = vector.load %arg3[%c0_2, %c0_3] : memref<16x128xf32, #tpu.memory_space<vmem>>, vector<16x128xf32>
    %5 = arith.subf %3, %4 : vector<16x128xf32>
    %6 = arith.mulf %5, %5 : vector<16x128xf32>
    %c1_i32 = arith.constant 1 : i32
    %7 = arith.muli %arg0, %c1_i32 : i32
    %8 = arith.addi %7, %arg1 : i32
    %c16_i32 = arith.constant 16 : i32
    %9 = arith.muli %8, %c16_i32 : i32
    %10 = tpu.iota {dimensions = array<i32: 0>} : vector<16x128xi32>
    %11 = vector.broadcast %9 : i32 to vector<16x128xi32>
    %12 = arith.addi %11, %10 : vector<16x128xi32>
    %c16_i32_4 = arith.constant 16 : i32
    %13 = vector.broadcast %c16_i32_4 : i32 to vector<16x128xi32>
    %14 = arith.cmpi slt, %12, %13 : vector<16x128xi32>
    %cst = arith.constant 0.000000e+00 : f32
    %15 = vector.broadcast %cst : f32 to vector<16x128xf32>
    %16 = arith.select %14, %6, %15 : vector<16x128xi1>, vector<16x128xf32>
    %c0_5 = arith.constant 0 : index
    %c0_6 = arith.constant 0 : index
    %17 = vector.load %arg5[%c0_5, %c0_6] : memref<1x128xf32, #tpu.memory_space<vmem>>, vector<1x128xf32>
    %cst_7 = arith.constant dense<0.000000e+00> : vector<128xf32>
    %18 = vector.multi_reduction <add>, %16, %cst_7 [0] : vector<16x128xf32> to vector<128xf32>
    %19 = vector.shape_cast %18 : vector<128xf32> to vector<1x128xf32>
    %20 = arith.addf %17, %19 : vector<1x128xf32>
    %c0_8 = arith.constant 0 : index
    %c0_9 = arith.constant 0 : index
    %21 = vector.load %arg5[%c0_8, %c0_9] : memref<1x128xf32, #tpu.memory_space<vmem>>, vector<1x128xf32>
    tpu.vector_store %arg5[%c0_8, %c0_9], %20 {strides = array<i32>} : memref<1x128xf32, #tpu.memory_space<vmem>>, vector<1x128xf32>,
    %c0_i32_10 = arith.constant 0 : i32
    %22 = arith.cmpi eq, %arg1, %c0_i32_10 : i32
    %23 = arith.extui %22 : i1 to i32
    %c0_i32_11 = arith.constant 0 : i32
    %24 = arith.cmpi ne, %23, %c0_i32_11 : i32
    scf.if %24 {
      %c0_12 = arith.constant 0 : index
      %c0_13 = arith.constant 0 : index
      %25 = vector.load %arg5[%c0_12, %c0_13] : memref<1x128xf32, #tpu.memory_space<vmem>>, vector<1x128xf32>
      %c0_14 = arith.constant 0 : index
      %c0_15 = arith.constant 0 : index
      %26 = vector.load %arg4[%c0_14, %c0_15] : memref<1x128xf32, #tpu.memory_space<vmem>>, vector<1x128xf32>
      tpu.vector_store %arg4[%c0_14, %c0_15], %25 {strides = array<i32>} : memref<1x128xf32, #tpu.memory_space<vmem>>, vector<1x128xf32>,
    } else {
    }
    return
  }
  func.func @transform_0(%arg0: i32, %arg1: i32) -> (i32, i32) {
    %c1_i32 = arith.constant 1 : i32
    %0 = arith.muli %arg0, %c1_i32 : i32
    %1 = arith.addi %0, %arg1 : i32
    %c0_i32 = arith.constant 0 : i32
    %2 = arith.minsi %1, %c0_i32 : i32
    %c0_i32_0 = arith.constant 0 : i32
    %c0_i32_1 = arith.constant 0 : i32
    return %2, %c0_i32_0 : i32, i32
  }
  func.func @transform_1(%arg0: i32, %arg1: i32) -> (i32, i32) {
    %c1_i32 = arith.constant 1 : i32
    %0 = arith.muli %arg0, %c1_i32 : i32
    %1 = arith.addi %0, %arg1 : i32
    %c0_i32 = arith.constant 0 : i32
    %2 = arith.minsi %1, %c0_i32 : i32
    %c0_i32_0 = arith.constant 0 : i32
    %c0_i32_1 = arith.constant 0 : i32
    return %2, %c0_i32_0 : i32, i32
  }
  func.func @transform_2(%arg0: i32, %arg1: i32) -> (i32, i32) {
    %c0_i32 = arith.constant 0 : i32
    %c0_i32_0 = arith.constant 0 : i32
    return %arg0, %c0_i32 : i32, i32
  }
}

</mosaic_0001>

<bundles_post_ra>
// kernel: tpu_custom_call.1
= control target key start
LH: loop header
LB: loop body
LE: loop exit
PB: predicated region body
PF: predicated region fallthrough
CT: control target
= control target key end

     0   :  { %7 = vsyncpa [#allocation4], 0  ;;  %s222_s0 = inlined_call_operand.hbm [shape: f32[16,128], index: 0, kind: input, shape index: {}]   ;;  %s223_s1 = inlined_call_operand.hbm [shape: f32[16,128], index: 1, kind: input, shape index: {}]   ;;  %s224_s2 = inlined_call_operand.hbm [shape: f32[1,128], index: 2, kind: output, shape index: {}]  }
   0x1   :  { %8 = vsyncpa [#allocation7], 0 }
   0x2   :  { %9 = vsyncpa [#allocation5], 0  ;;  %s192_s9 = smov [#allocation3]  }
   0x3   :  { %s21_s10 = sshll.u32 %s192_s9, 4  ;;  %s22_s10 = int_to_ptr.vmem [resolvable:$true] %s21_s10 }
   0x4   :  { %s134_s11 = scalar_lea.vmem %s22_s10, 256  ;;  %p139_p1 = scmp.lt.s32.totalorder %s22_s10, %s22_s10 }
   0x5   :  { %p135_p0 = scmp.ne.s32.totalorder %s22_s10, %s134_s11  ;;  %p140_p2 = scmp.lt.s32.totalorder %s134_s11, %s134_s11 }
   0x7   :  { %p141_p3 = por %p140_p2, %p139_p1 }
   0x9   :  { %p142_p4 = pnand %p141_p3, %p135_p0 }
   0xb   :  { %145 = shalt.err (!%p142_p4)
}
   0xc   :  { %s193_s12 = smov 128   ;;  %s194_s13 = smov 8  }
   0xd   :  { %27 = dma.hbm_to_vmem [thread:$0]  %s222_s0, 256, %s22_s10, [#allocation4], %s193_s12, %s193_s12, %s194_s13  }
   0xe   :  { %s195_s16 = smov [#allocation6]  }
   0xf   :  { %s39_s17 = sshll.u32 %s195_s16, 4  ;;  %s40_s17 = int_to_ptr.vmem [resolvable:$true] %s39_s17 }
  0x10   :  { %s154_s18 = scalar_lea.vmem %s40_s17, 256  ;;  %p159_p6 = scmp.lt.s32.totalorder %s40_s17, %s40_s17 }
  0x11   :  { %p155_p5 = scmp.ne.s32.totalorder %s40_s17, %s154_s18  ;;  %p160_p7 = scmp.lt.s32.totalorder %s154_s18, %s154_s18 }
  0x13   :  { %p161_p8 = por %p160_p7, %p159_p6 }
  0x15   :  { %p162_p9 = pnand %p161_p8, %p155_p5 }
  0x17   :  { %165 = shalt.err (!%p162_p9)
}
  0x18   :  { %45 = dma.hbm_to_vmem [thread:$0]  %s223_s1, 256, %s40_s17, [#allocation7], %s193_s12, %s193_s12, %s194_s13  }
  0x19   :  { %186 = dma.done.wait [#allocation4], 256  }
  0x1a   :  { %187 = vsyncadd [#allocation4], 4294967040 }
  0x1b   :  { %188 = dma.done.wait [#allocation7], 256  }
  0x1c   :  { %189 = vsyncadd [#allocation7], 4294967040  ;;  %v196_v0 = vmov 0.0   ;;  %v65_v1 = vld [vmem:[#allocation3] sm:$0xff]  ;;  %v66_v2 = vld [vmem:[#allocation3 + $0x8] sm:$0xff]  ;;  %s197_s0 = smov [#allocation8]  }
  0x1d   :  { %64 = vst [vmem:[#allocation2] sm:$0x1] %v196_v0  ;;  %v67_v3 = vld [vmem:[#allocation6] sm:$0xff]  ;;  %v68_v4 = vld [vmem:[#allocation6 + $0x8] sm:$0xff]  ;;  %s106_s1 = sshll.u32 %s197_s0, 4  ;;  %s107_s1 = int_to_ptr.vmem [resolvable:$true] %s106_s1 }
  0x1e   :  { %v69_v5 = vsub.f32 %v65_v1, %v67_v3  ;;  %v70_v6 = vsub.f32 %v66_v2, %v68_v4  ;;  %s166_s21 = scalar_lea.vmem %s107_s1, 16  ;;  %s170_s22 = scalar_lea.vmem %s107_s1, 32 }
  0x1f   :  { %p167_p10 = scmp.ne.s32.totalorder %s107_s1, %s166_s21  ;;  %p171_p11 = scmp.lt.s32.totalorder %s107_s1, %s107_s1 }
  0x20   :  { %v71_v7 = vmul.f32 %v69_v5, %v69_v5  ;;  %v72_v8 = vmul.f32 %v70_v6, %v70_v6  ;;  %p172_p12 = scmp.lt.s32.totalorder %s170_s22, %s166_s21 }
  0x22   :  { %v86_v9 = vadd.f32 %v72_v8, %v71_v7  ;;  %p173_p13 = por %p172_p12, %p171_p11 }
  0x24   :  { %v87_v10 = vrot.slane %v86_v9, 4  ;;  %v85_v15 = vld [vmem:[#allocation2] sm:$0x1]  ;;  %p174_p0 = pnand %p173_p13, %p167_p10 }
  0x26   :  { %v88_v11 = vadd.f32 %v87_v10, %v86_v9 }
  0x28   :  { %v89_v12 = vrot.slane %v88_v11, 2 }
  0x2a   :  { %v90_v13 = vadd.f32 %v89_v12, %v88_v11 }
  0x2c   :  { %v91_v14 = vrot.slane %v90_v13, 1 }
  0x2e   :  { %v92_v16 = vadd.f32 %v91_v14, %v90_v13 }
  0x30   :  { %v93_v17 = vadd.f32 %v92_v16, %v85_v15 }
  0x32   :  { %94 = vst [vmem:[#allocation2] sm:$0x1] %v93_v17 }
  0x39   :  { %v98_v18 = vld [vmem:[#allocation2] sm:$0x1] }
  0x3a   :  { %99 = vst [vmem:[#allocation8] sm:$0x1] %v98_v18 }
  0x3b   :  { %177 = shalt.err (!%p174_p0)
}
  0x3c   :  { %109 = dma.vmem_to_hbm [thread:$0]  %s107_s1, 16, %s224_s2, [#allocation5]  }
  0x3d   :  { %190 = dma.done.wait [#allocation5], 16  }
  0x3e   :  { %191 = vsyncadd [#allocation5], 4294967280 }
  0x3f   :  { %113 = vsyncpa [#allocation4], 1 }
  0x40   :  { %114 = vsyncpa [#allocation7], 1 }
  0x41   :  { %115 = vsyncpa [#allocation5], 1 }

</bundles_post_ra>
